<compile_context>
chip_gen: v5e
topology: v5e:2x2
jax: 0.10.0
libtpu: 0.0.40
codegen_flags: <defaults>
</compile_context>

<pallas_src>
import jax
import jax.numpy as jnp
from jax.experimental import pallas as pl
from jax.experimental.pallas import tpu as pltpu

_LANE = 128
_TARGET_TILE_BYTES = 4 * 1024 * 1024       # ~4 MiB/tile -> ~16 MiB live (in+out, depth 2)
_VMEM_LIMIT_BYTES = 64 * 1024 * 1024       # safe on v5e/v6e (128 MiB) and v7x (64 MiB)
_SINGLE_BLOCK_MAX_BYTES = 8 * 1024 * 1024  # fallback for sizes not a multiple of 128


def _copy_kernel(x_ref, o_ref):
    # Pure pass-through: whole-tile VMEM copy.
    o_ref[...] = x_ref[...]


def _copy_2d_tiled(x2: jax.Array, tile_r: int) -> jax.Array:
    """Row-tiled, software-pipelined copy of a lane-dense (rows, cols) slab."""
    rows, cols = x2.shape
    nbytes = x2.size * jnp.dtype(x2.dtype).itemsize
    return pl.pallas_call(
        _copy_kernel,
        out_shape=jax.ShapeDtypeStruct((rows, cols), x2.dtype),
        grid_spec=pltpu.PrefetchScalarGridSpec(
            num_scalar_prefetch=0,
            grid=(pl.cdiv(rows, tile_r),),   # ragged last block is masked by Pallas
            in_specs=[pl.BlockSpec((tile_r, cols), lambda i: (i, 0))],
            out_specs=pl.BlockSpec((tile_r, cols), lambda i: (i, 0)),
        ),
        cost_estimate=pl.CostEstimate(
            flops=0, transcendentals=0, bytes_accessed=2 * nbytes),
        compiler_params=pltpu.CompilerParams(
            dimension_semantics=("parallel",),   # shard rows across TCs on v7x
            vmem_limit_bytes=_VMEM_LIMIT_BYTES,
        ),
    )(x2)


def _copy_single_block(x2: jax.Array) -> jax.Array:
    """Whole-array single-block copy (for small / ragged sizes)."""
    nbytes = x2.size * jnp.dtype(x2.dtype).itemsize
    return pl.pallas_call(
        _copy_kernel,
        out_shape=jax.ShapeDtypeStruct(x2.shape, x2.dtype),
        cost_estimate=pl.CostEstimate(
            flops=0, transcendentals=0, bytes_accessed=2 * nbytes),
        compiler_params=pltpu.CompilerParams(
            vmem_limit_bytes=_VMEM_LIMIT_BYTES),
    )(x2)


def _copy_flat_lane_multiple(flat: jax.Array) -> jax.Array:
    """Tiled copy of a 1D array whose length is a multiple of 128 (no padding)."""
    n = flat.size
    itemsize = jnp.dtype(flat.dtype).itemsize
    # Widest lane-dense column count that divides n exactly.
    cols = _LANE
    for c in (8192, 4096, 2048, 1024, 512, 256):
        if n % c == 0:
            cols = c
            break
    rows = n // cols
    sub = max(8, 32 // itemsize)   # sublane multiple: 8 f32 / 16 bf16 / 32 int8
    if rows <= sub:
        tile_r = rows              # single block; row dim equals full array dim
    else:
        # dtype-aware byte budget, rounded down to the sublane multiple
        tile_r = max(sub, (_TARGET_TILE_BYTES // (cols * itemsize)) // sub * sub)
        # guarantee >= 2 grid steps so v7x's second TensorCore gets work
        half_rows = ((rows + 1) // 2 + sub - 1) // sub * sub
        tile_r = min(tile_r, half_rows)
    return _copy_2d_tiled(flat.reshape(rows, cols), tile_r).reshape(-1)


def _materializing_copy(x: jax.Array) -> jax.Array:
    orig_shape = x.shape
    n = x.size
    itemsize = jnp.dtype(x.dtype).itemsize
    flat = x.reshape(-1)   # contiguous reshape: bitcast-level view, no extra HBM pass

    if n % _LANE == 0:
        return _copy_flat_lane_multiple(flat).reshape(orig_shape)

    if n * itemsize <= _SINGLE_BLOCK_MAX_BYTES:
        # Ragged size: one lane-masked block, still a single read + write.
        return _copy_single_block(flat.reshape(1, n)).reshape(orig_shape)

    # TODO(synk): very large arrays whose element count is not a multiple of
    # 128 take this rare pad+slice fallback (two extra HBM passes).
    pad_n = -(-n // _LANE) * _LANE
    out = _copy_flat_lane_multiple(jnp.pad(flat, (0, pad_n - n)))
    return out[:n].reshape(orig_shape)


def identity_forward(x: jax.Array, *, materialize: bool = False) -> jax.Array:
    """Pallas implementation of Identity.forward(x) -> x.

    Default: returns `x` unchanged — identity is semantically a no-op, so the
    fastest kernel is no kernel (zero HBM traffic, zero launch cost).
    With materialize=True, a fresh buffer is produced by a tiled,
    HBM-roofline-bound Pallas copy kernel.
    """
    if not materialize or x.size == 0:
        return x
    return _materializing_copy(x)


if __name__ == "__main__":
    key = jax.random.PRNGKey(0)
    # Small NCHW-shaped example consistent with an encoder feature map.
    x = jax.random.normal(key, (2, 4, 16, 16), dtype=jnp.float32)

    # Default path: true no-op (no kernel, no copy).
    y_fast = identity_forward(x)
    assert y_fast is x

    # Forced path: run the Pallas copy kernel once and verify exact equality.
    y = identity_forward(x, materialize=True)
    y = jax.block_until_ready(y)
    assert y.shape == x.shape, (y.shape, x.shape)
    assert y.dtype == x.dtype, (y.dtype, x.dtype)
    assert bool(jnp.all(y == x)), "identity output mismatch"

    # Extra (tiny) coverage: multi-step tiled grid path (bf16, >=2 grid steps)
    # and a ragged size that is not a multiple of 128.
    xb = jax.random.normal(key, (8, 32, 32, 32), dtype=jnp.bfloat16)
    yb = jax.block_until_ready(identity_forward(xb, materialize=True))
    assert bool(jnp.all(yb == xb)), "identity output mismatch (bf16 tiled path)"

    xr = jax.random.normal(key, (3, 5, 7), dtype=jnp.float32)
    yr = jax.block_until_ready(identity_forward(xr, materialize=True))
    assert bool(jnp.all(yr == xr)), "identity output mismatch (ragged path)"

    print("KERNEL_OK")
</pallas_src>

<mosaic_0001>
module attributes {stable_mosaic.version = 11 : i64} {
  func.func @_copy_kernel(%arg0: i32, %arg1: memref<1x2048xf32, #tpu.memory_space<vmem>>, %arg2: memref<1x2048xf32, #tpu.memory_space<vmem>>) attributes {dimension_semantics = [#tpu.dimension_semantics<parallel>], iteration_bounds = array<i64: 1>, scalar_prefetch = 0 : i64, scratch_operands = 0 : i64, tpu.core_type = #tpu.core_type<tc>, window_params = [{transform_indices = @transform_0, window_bounds = array<i64: 1, 2048>}, {transform_indices = @transform_1, window_bounds = array<i64: 1, 2048>}]} {
    %c0 = arith.constant 0 : index
    %c0_0 = arith.constant 0 : index
    %0 = vector.load %arg1[%c0, %c0_0] : memref<1x2048xf32, #tpu.memory_space<vmem>>, vector<1x2048xf32>
    %c0_1 = arith.constant 0 : index
    %c0_2 = arith.constant 0 : index
    %1 = vector.load %arg2[%c0_1, %c0_2] : memref<1x2048xf32, #tpu.memory_space<vmem>>, vector<1x2048xf32>
    tpu.vector_store %arg2[%c0_1, %c0_2], %0 {strides = array<i32>} : memref<1x2048xf32, #tpu.memory_space<vmem>>, vector<1x2048xf32>,
    return
  }
  func.func @transform_0(%arg0: i32) -> (i32, i32) {
    %c0_i32 = arith.constant 0 : i32
    %c0_i32_0 = arith.constant 0 : i32
    return %arg0, %c0_i32 : i32, i32
  }
  func.func @transform_1(%arg0: i32) -> (i32, i32) {
    %c0_i32 = arith.constant 0 : i32
    %c0_i32_0 = arith.constant 0 : i32
    return %arg0, %c0_i32 : i32, i32
  }
}

</mosaic_0001>

<bundles_post_ra>
// kernel: tpu_custom_call.1
= control target key start
LH: loop header
LB: loop body
LE: loop exit
PB: predicated region body
PF: predicated region fallthrough
CT: control target
= control target key end

     0   :  { %6 = vsyncpa [#allocation3], 0  ;;  %s116_s0 = inlined_call_operand.hbm [shape: f32[1,2048], index: 0, kind: input, shape index: {}]   ;;  %s117_s1 = inlined_call_operand.hbm [shape: f32[1,2048], index: 1, kind: output, shape index: {}]  }
   0x1   :  { %7 = vsyncpa [#allocation4], 0  ;;  %s13_s8 = sshll.u32 %s116_s0, 4  ;;  %s98_s9 = smov [#allocation2]   ;;  %s14_s8 = int_to_ptr.hbm [resolvable:$true] %s13_s8 }
   0x2   :  { %s15_s10 = sshll.u32 %s98_s9, 4  ;;  %s16_s10 = int_to_ptr.vmem [resolvable:$true] %s15_s10 }
   0x3   :  { %18 = dma.hbm_to_vmem [thread:$0]  %s14_s8, 256, %s16_s10, [#allocation3]  }
   0x4   :  { %94 = dma.done.wait [#allocation3], 256  }
   0x5   :  { %95 = vsyncadd [#allocation3], 4294967040  ;;  %s99_s11 = smov [#allocation5]   ;;  %s34_s15 = sshll.u32 %s117_s1, 4  ;;  %v23_v0 = vld [vmem:[#allocation2] sm:$0xff]  ;;  %v24_v1 = vld [vmem:[#allocation2 + $0x8] sm:$0xff]  ;;  %s35_s15 = int_to_ptr.hbm [resolvable:$true] %s34_s15 }
   0x6   :  { %s32_s12 = sshll.u32 %s99_s11, 4  ;;  %25 = vst [vmem:[#allocation5] sm:$0xff] %v23_v0  ;;  %s33_s12 = int_to_ptr.vmem [resolvable:$true] %s32_s12 }
   0x7   :  { %26 = vst [vmem:[#allocation5 + $0x8] sm:$0xff] %v24_v1 }
   0x8   :  { %37 = dma.vmem_to_hbm [thread:$0]  %s33_s12, 256, %s35_s15, [#allocation4]  }
   0x9   :  { %96 = dma.done.wait [#allocation4], 256  }
   0xa   :  { %97 = vsyncadd [#allocation4], 4294967040 }
   0xb   :  { %42 = vsyncpa [#allocation3], 1 }
   0xc   :  { %43 = vsyncpa [#allocation4], 1 }

</bundles_post_ra>
